<compile_context>
chip_gen: v7x
topology: tpu7x:2x2x1
jax: 0.10.0
libtpu: 0.0.40
codegen_flags: <defaults>
</compile_context>

<pallas_src>
import functools
import math

import jax
import jax.numpy as jnp
from jax.experimental import pallas as pl
from jax.experimental.pallas import tpu as pltpu


def _attention_kernel(scale, q_ref, k_ref, v_ref, spread_ref, gsum_ref,
                      expand_ref, fold_ref, e_ref, o_ref):
    # q_ref: (Bb, Q)        query rows
    # k_ref: (Bb, T*Q)      keys,   flattened as [b, t*Q + d]
    # v_ref: (Bb, T*V)      values, flattened as [b, t*V + w]
    # spread: (Q, T*Q)      spread[d, j] = 1 iff j % Q == d   (replicate q along lanes)
    # gsum:   (T*Q, T)      gsum[j, t]   = 1 iff j // Q == t  (per-timestep reduction)
    # expand: (T, T*V)      expand[t, j] = 1 iff j // V == t  (replicate e along lanes)
    # fold:   (T*V, V)      fold[j, w]   = 1 iff j % V == w   (sum over timesteps)
    dt = k_ref.dtype
    q = q_ref[...]
    k = k_ref[...]
    v = v_ref[...]

    # scores[b, t] = scale * sum_d q[b, d] * keys[b, t, d]
    q_rep = jnp.dot(q, spread_ref[...], preferred_element_type=dt)          # (Bb, T*Q)
    s = jnp.dot(q_rep * k, gsum_ref[...],
                preferred_element_type=jnp.float32) * scale                 # (Bb, T)

    # numerically stable softmax over T (lane axis)
    m = jnp.max(s, axis=-1, keepdims=True)
    p = jnp.exp(s - m)
    denom = jnp.sum(p, axis=-1, keepdims=True)
    inv = pl.reciprocal(denom, approx=True)          # EUP slot, nearly free
    inv = inv * (2.0 - denom * inv)                  # one Newton step -> ~f32 accuracy
    e = p * inv                                      # (Bb, T), f32
    e_ref[...] = e.astype(e_ref.dtype)               # dense (Bb, T) slab

    # linear_combination[b, w] = sum_t e[b, t] * values[b, t, w]
    e_rep = jnp.dot(e.astype(dt), expand_ref[...], preferred_element_type=dt)   # (Bb, T*V)
    o = jnp.dot(e_rep * v, fold_ref[...], preferred_element_type=jnp.float32)   # (Bb, V)
    o_ref[...] = o.astype(o_ref.dtype)


def _round_up(x, m):
    return ((x + m - 1) // m) * m


@functools.partial(jax.jit, static_argnames=("block_b",))
def attention(query, keys, values, *, block_b=512):
    """query: [1, B, Q], keys: [B, T, Q], values: [B, T, V].

    Returns (energy [B, 1, T], linear_combination [B, V]) — same as the
    PyTorch module's forward().
    """
    _, B, Q = query.shape
    Bk, T, K = keys.shape
    Bv, Tv, V = values.shape
    assert Q == K and B == Bk == Bv and T == Tv

    out_dtype = query.dtype
    cdt = keys.dtype
    scale = 1.0 / math.sqrt(Q)

    # ---- batch tiling -------------------------------------------------------
    if B <= 8:
        Bb = B                              # one tiny block (block == full dims)
    else:
        # >= 2 grid steps (both TensorCores on v7x), tile capped so the k/v
        # blocks stay ~0.5 MB each (fits v7x's 64 MiB VMEM / v5e's 16 MiB
        # scoped default comfortably, double-buffered).
        Bb = min(_round_up(pl.cdiv(B, 2), 8), block_b)
    n_blocks = pl.cdiv(B, Bb)
    Bpad = n_blocks * Bb

    # ---- lane-dense 2-D slabs (contiguous reshapes, free in XLA) ------------
    q2 = jnp.reshape(query, (B, Q))          # [1,B,Q] -> [B,Q]
    k2 = jnp.reshape(keys, (B, T * Q))       # [b, t*Q + d]
    v2 = jnp.reshape(values, (B, T * V))     # [b, t*V + w]
    if Bpad != B:                            # zero-pad tail; padded rows give a
        pad = Bpad - B                       # finite uniform softmax, sliced off below
        q2 = jnp.pad(q2, ((0, pad), (0, 0)))
        k2 = jnp.pad(k2, ((0, pad), (0, 0)))
        v2 = jnp.pad(v2, ((0, pad), (0, 0)))

    # ---- tiny constant replicate / group-sum matrices -----------------------
    j_tq = jnp.arange(T * Q)
    j_tv = jnp.arange(T * V)
    spread = (j_tq[None, :] % Q == jnp.arange(Q)[:, None]).astype(cdt)       # (Q, T*Q)
    gsum = (j_tq[:, None] // Q == jnp.arange(T)[None, :]).astype(cdt)        # (T*Q, T)
    expand = (j_tv[None, :] // V == jnp.arange(T)[:, None]).astype(cdt)      # (T, T*V)
    fold = (j_tv[:, None] % V == jnp.arange(V)[None, :]).astype(cdt)         # (T*V, V)

    kernel = functools.partial(_attention_kernel, scale)

    energy2d, lin2d = pl.pallas_call(
        kernel,
        grid=(n_blocks,),
        in_specs=[
            pl.BlockSpec((Bb, Q), lambda b: (b, 0)),          # q
            pl.BlockSpec((Bb, T * Q), lambda b: (b, 0)),      # keys (flattened)
            pl.BlockSpec((Bb, T * V), lambda b: (b, 0)),      # values (flattened)
            pl.BlockSpec((Q, T * Q), lambda b: (0, 0)),       # spread
            pl.BlockSpec((T * Q, T), lambda b: (0, 0)),       # gsum
            pl.BlockSpec((T, T * V), lambda b: (0, 0)),       # expand
            pl.BlockSpec((T * V, V), lambda b: (0, 0)),       # fold
        ],
        out_specs=[
            pl.BlockSpec((Bb, T), lambda b: (b, 0)),          # energy slab
            pl.BlockSpec((Bb, V), lambda b: (b, 0)),          # linear combination slab
        ],
        out_shape=[
            jax.ShapeDtypeStruct((Bpad, T), out_dtype),
            jax.ShapeDtypeStruct((Bpad, V), out_dtype),
        ],
        compiler_params=pltpu.CompilerParams(
            dimension_semantics=("parallel",)),
    )(q2, k2, v2, spread, gsum, expand, fold)

    energy = jnp.reshape(energy2d[:B], (B, 1, T))
    lin = lin2d[:B]
    return energy, lin


def _reference(query, keys, values):
    # Pure-JAX mirror of the PyTorch forward.
    Q = query.shape[2]
    q_t = jnp.transpose(query, (1, 0, 2))                        # [B, 1, Q]
    scores = jnp.einsum("bij,bkj->bik", q_t, keys) / math.sqrt(Q)
    e = jax.nn.softmax(scores, axis=2)                           # [B, 1, T]
    lin = jnp.einsum("bik,bkv->biv", e, values)[:, 0]            # [B, V]
    return e, lin


if __name__ == "__main__":
    # Small shapes consistent with the module; the second case exercises
    # multiple grid steps plus tail padding.
    for (B, T, Q, V) in [(2, 8, 32, 32), (20, 8, 32, 32)]:
        key = jax.random.PRNGKey(0)
        kq, kk, kv = jax.random.split(key, 3)
        query = jax.random.normal(kq, (1, B, Q), dtype=jnp.float32)
        keys = jax.random.normal(kk, (B, T, Q), dtype=jnp.float32)
        values = jax.random.normal(kv, (B, T, V), dtype=jnp.float32)

        energy, lin = attention(query, keys, values)
        jax.block_until_ready((energy, lin))

        e_ref, lin_ref = _reference(query, keys, values)
        assert energy.shape == (B, 1, T) and lin.shape == (B, V)
        # 1e-4 tolerance: approx-reciprocal + one Newton step is ~f32-exact.
        assert jnp.allclose(energy, e_ref, atol=1e-4, rtol=1e-4)
        assert jnp.allclose(lin, lin_ref, atol=1e-4, rtol=1e-4)

    print("KERNEL_OK")
</pallas_src>

<mosaic_0001>
module attributes {stable_mosaic.version = 11 : i64} {
  func.func @_attention_kernel(%arg0: i32, %arg1: memref<2x32xf32, #tpu.memory_space<vmem>>, %arg2: memref<2x256xf32, #tpu.memory_space<vmem>>, %arg3: memref<2x256xf32, #tpu.memory_space<vmem>>, %arg4: memref<32x256xf32, #tpu.memory_space<vmem>>, %arg5: memref<256x8xf32, #tpu.memory_space<vmem>>, %arg6: memref<8x256xf32, #tpu.memory_space<vmem>>, %arg7: memref<256x32xf32, #tpu.memory_space<vmem>>, %arg8: memref<2x8xf32, #tpu.memory_space<vmem>>, %arg9: memref<2x32xf32, #tpu.memory_space<vmem>>) attributes {dimension_semantics = [#tpu.dimension_semantics<parallel>], iteration_bounds = array<i64: 1>, scalar_prefetch = 0 : i64, scratch_operands = 0 : i64, tpu.core_type = #tpu.core_type<tc>, window_params = [{transform_indices = @transform_0, window_bounds = array<i64: 2, 32>}, {transform_indices = @transform_1, window_bounds = array<i64: 2, 256>}, {transform_indices = @transform_2, window_bounds = array<i64: 2, 256>}, {pipeline_mode = #tpu.pipeline_mode<synchronous>, transform_indices = @transform_3, window_bounds = array<i64: 32, 256>}, {pipeline_mode = #tpu.pipeline_mode<synchronous>, transform_indices = @transform_4, window_bounds = array<i64: 256, 8>}, {pipeline_mode = #tpu.pipeline_mode<synchronous>, transform_indices = @transform_5, window_bounds = array<i64: 8, 256>}, {pipeline_mode = #tpu.pipeline_mode<synchronous>, transform_indices = @transform_6, window_bounds = array<i64: 256, 32>}, {transform_indices = @transform_7, window_bounds = array<i64: 2, 8>}, {transform_indices = @transform_8, window_bounds = array<i64: 2, 32>}]} {
    %c0 = arith.constant 0 : index
    %c0_0 = arith.constant 0 : index
    %0 = vector.load %arg1[%c0, %c0_0] : memref<2x32xf32, #tpu.memory_space<vmem>>, vector<2x32xf32>
    %c0_1 = arith.constant 0 : index
    %c0_2 = arith.constant 0 : index
    %1 = vector.load %arg2[%c0_1, %c0_2] : memref<2x256xf32, #tpu.memory_space<vmem>>, vector<2x256xf32>
    %c0_3 = arith.constant 0 : index
    %c0_4 = arith.constant 0 : index
    %2 = vector.load %arg3[%c0_3, %c0_4] : memref<2x256xf32, #tpu.memory_space<vmem>>, vector<2x256xf32>
    %c0_5 = arith.constant 0 : index
    %c0_6 = arith.constant 0 : index
    %3 = vector.load %arg4[%c0_5, %c0_6] : memref<32x256xf32, #tpu.memory_space<vmem>>, vector<32x256xf32>
    %cst = arith.constant dense<0.000000e+00> : vector<2x256xf32>
    %4 = tpu.matmul %0, %3, %cst {dimension_numbers = #tpu.dot_dimension_numbers<[1], [0], [0], [1], [0, 0, 1, 1], [], []>} : vector<2x32xf32>, vector<32x256xf32>, vector<2x256xf32> -> vector<2x256xf32>
    %5 = arith.mulf %4, %1 : vector<2x256xf32>
    %c0_7 = arith.constant 0 : index
    %c0_8 = arith.constant 0 : index
    %6 = vector.load %arg5[%c0_7, %c0_8] : memref<256x8xf32, #tpu.memory_space<vmem>>, vector<256x8xf32>
    %cst_9 = arith.constant dense<0.000000e+00> : vector<2x8xf32>
    %7 = tpu.matmul %5, %6, %cst_9 {dimension_numbers = #tpu.dot_dimension_numbers<[1], [0], [0], [1], [0, 0, 1, 1], [], []>} : vector<2x256xf32>, vector<256x8xf32>, vector<2x8xf32> -> vector<2x8xf32>
    %cst_10 = arith.constant 0.176776692 : f32
    %8 = vector.broadcast %cst_10 : f32 to vector<2x8xf32>
    %9 = arith.mulf %7, %8 : vector<2x8xf32>
    %cst_11 = arith.constant dense<0xFF800000> : vector<2xf32>
    %10 = vector.multi_reduction <maximumf>, %9, %cst_11 [1] : vector<2x8xf32> to vector<2xf32>
    %11 = vector.shape_cast %10 : vector<2xf32> to vector<2x1xf32>
    %12 = vector.broadcast %11 : vector<2x1xf32> to vector<2x8xf32>
    %13 = arith.subf %9, %12 : vector<2x8xf32>
    %14 = math.exp %13 : vector<2x8xf32>
    %cst_12 = arith.constant dense<0.000000e+00> : vector<2xf32>
    %15 = vector.multi_reduction <add>, %14, %cst_12 [1] : vector<2x8xf32> to vector<2xf32>
    %16 = vector.shape_cast %15 : vector<2xf32> to vector<2x1xf32>
    %17 = tpu.reciprocal %16 {approx = true} : vector<2x1xf32> -> vector<2x1xf32>
    %18 = arith.mulf %16, %17 : vector<2x1xf32>
    %cst_13 = arith.constant 2.000000e+00 : f32
    %19 = vector.broadcast %cst_13 : f32 to vector<2x1xf32>
    %20 = arith.subf %19, %18 : vector<2x1xf32>
    %21 = arith.mulf %17, %20 : vector<2x1xf32>
    %22 = vector.broadcast %21 : vector<2x1xf32> to vector<2x8xf32>
    %23 = arith.mulf %14, %22 : vector<2x8xf32>
    %c0_14 = arith.constant 0 : index
    %c0_15 = arith.constant 0 : index
    %24 = vector.load %arg8[%c0_14, %c0_15] : memref<2x8xf32, #tpu.memory_space<vmem>>, vector<2x8xf32>
    tpu.vector_store %arg8[%c0_14, %c0_15], %23 {strides = array<i32>} : memref<2x8xf32, #tpu.memory_space<vmem>>, vector<2x8xf32>,
    %c0_16 = arith.constant 0 : index
    %c0_17 = arith.constant 0 : index
    %25 = vector.load %arg6[%c0_16, %c0_17] : memref<8x256xf32, #tpu.memory_space<vmem>>, vector<8x256xf32>
    %cst_18 = arith.constant dense<0.000000e+00> : vector<2x256xf32>
    %26 = tpu.matmul %23, %25, %cst_18 {dimension_numbers = #tpu.dot_dimension_numbers<[1], [0], [0], [1], [0, 0, 1, 1], [], []>} : vector<2x8xf32>, vector<8x256xf32>, vector<2x256xf32> -> vector<2x256xf32>
    %27 = arith.mulf %26, %2 : vector<2x256xf32>
    %c0_19 = arith.constant 0 : index
    %c0_20 = arith.constant 0 : index
    %28 = vector.load %arg7[%c0_19, %c0_20] : memref<256x32xf32, #tpu.memory_space<vmem>>, vector<256x32xf32>
    %cst_21 = arith.constant dense<0.000000e+00> : vector<2x32xf32>
    %29 = tpu.matmul %27, %28, %cst_21 {dimension_numbers = #tpu.dot_dimension_numbers<[1], [0], [0], [1], [0, 0, 1, 1], [], []>} : vector<2x256xf32>, vector<256x32xf32>, vector<2x32xf32> -> vector<2x32xf32>
    %c0_22 = arith.constant 0 : index
    %c0_23 = arith.constant 0 : index
    %30 = vector.load %arg9[%c0_22, %c0_23] : memref<2x32xf32, #tpu.memory_space<vmem>>, vector<2x32xf32>
    tpu.vector_store %arg9[%c0_22, %c0_23], %29 {strides = array<i32>} : memref<2x32xf32, #tpu.memory_space<vmem>>, vector<2x32xf32>,
    return
  }
  func.func @transform_0(%arg0: i32) -> (i32, i32) {
    %c0_i32 = arith.constant 0 : i32
    %c0_i32_0 = arith.constant 0 : i32
    return %arg0, %c0_i32 : i32, i32
  }
  func.func @transform_1(%arg0: i32) -> (i32, i32) {
    %c0_i32 = arith.constant 0 : i32
    %c0_i32_0 = arith.constant 0 : i32
    return %arg0, %c0_i32 : i32, i32
  }
  func.func @transform_2(%arg0: i32) -> (i32, i32) {
    %c0_i32 = arith.constant 0 : i32
    %c0_i32_0 = arith.constant 0 : i32
    return %arg0, %c0_i32 : i32, i32
  }
  func.func @transform_3(%arg0: i32) -> (i32, i32) {
    %c0_i32 = arith.constant 0 : i32
    %c0_i32_0 = arith.constant 0 : i32
    %c0_i32_1 = arith.constant 0 : i32
    return %c0_i32, %c0_i32_0 : i32, i32
  }
  func.func @transform_4(%arg0: i32) -> (i32, i32) {
    %c0_i32 = arith.constant 0 : i32
    %c0_i32_0 = arith.constant 0 : i32
    %c0_i32_1 = arith.constant 0 : i32
    return %c0_i32, %c0_i32_0 : i32, i32
  }
  func.func @transform_5(%arg0: i32) -> (i32, i32) {
    %c0_i32 = arith.constant 0 : i32
    %c0_i32_0 = arith.constant 0 : i32
    %c0_i32_1 = arith.constant 0 : i32
    return %c0_i32, %c0_i32_0 : i32, i32
  }
  func.func @transform_6(%arg0: i32) -> (i32, i32) {
    %c0_i32 = arith.constant 0 : i32
    %c0_i32_0 = arith.constant 0 : i32
    %c0_i32_1 = arith.constant 0 : i32
    return %c0_i32, %c0_i32_0 : i32, i32
  }
  func.func @transform_7(%arg0: i32) -> (i32, i32) {
    %c0_i32 = arith.constant 0 : i32
    %c0_i32_0 = arith.constant 0 : i32
    return %arg0, %c0_i32 : i32, i32
  }
  func.func @transform_8(%arg0: i32) -> (i32, i32) {
    %c0_i32 = arith.constant 0 : i32
    %c0_i32_0 = arith.constant 0 : i32
    return %arg0, %c0_i32 : i32, i32
  }
}

</mosaic_0001>

<bundles_post_ra>
// kernel: attention.1
= control target key start
LH: loop header
LB: loop body
LE: loop exit
PB: predicated region body
PF: predicated region fallthrough
CT: control target
= control target key end

     0   :  { %14 = vsyncpa [#allocation3], 0  ;;  %v671_v7 = vmov 0.0   ;;  %vm41_vm0 = vcmask 261120   ;;  %s977_s0 = inlined_call_operand.vmem [shape: f32[2,32], index: 0, kind: input, shape index: {}]   ;;  %s978_s1 = inlined_call_operand.vmem [shape: f32[2,256], index: 1, kind: input, shape index: {}]   ;;  %s979_s2 = inlined_call_operand.vmem [shape: f32[2,256], index: 2, kind: input, shape index: {}]   ;;  %s980_s3 = inlined_call_operand.vmem [shape: f32[32,256], index: 3, kind: input, shape index: {}]   ;;  %s981_s4 = inlined_call_operand.vmem [shape: f32[256,8], index: 4, kind: input, shape index: {}]   ;;  %s982_s5 = inlined_call_operand.vmem [shape: f32[8,256], index: 5, kind: input, shape index: {}]   ;;  %s983_s6 = inlined_call_operand.vmem [shape: f32[256,32], index: 6, kind: input, shape index: {}]   ;;  %s984_s7 = inlined_call_operand.hbm [shape: f32[2,8], index: 7, kind: output, shape index: {0}]   ;;  %s985_s8 = inlined_call_operand.hbm [shape: f32[2,32], index: 8, kind: output, shape index: {1}]  }
   0x1   :  { %v34_v0 = vld [vmem:[%s980_s3 + $0x8] sm:$0xff]  ;;  %v36_v1 = vld [vmem:[%s980_s3 + $0x18] sm:$0xff]  ;;  %v33_v2 = vld [vmem:[%s980_s3] sm:$0xff]  ;;  %109 = vmatprep.mubr.f32.mxu1 %v671_v7  ;;  %318 = vmatprep.mubr.f32.mxu0 %v671_v7 }
   0x2   :  { %v544_v3 = vpack.c.bf16 %v36_v1, %v34_v0  ;;  %v35_v4 = vld [vmem:[%s980_s3 + $0x10] sm:$0xff]  ;;  %v38_v5 = vld [vmem:[%s980_s3 + $0x28] sm:$0xff]  ;;  %v40_v6 = vld [vmem:[%s980_s3 + $0x38] sm:$0xff] }
   0x3   :  { %v546_v8 = vpack.c.bf16 %v35_v4, %v33_v2  ;;  %v548_v9 = vpack.c.bf16 %v40_v6, %v38_v5  ;;  %v37_v10 = vld [vmem:[%s980_s3 + $0x20] sm:$0xff]  ;;  %v39_v11 = vld [vmem:[%s980_s3 + $0x30] sm:$0xff]  ;;  %v146_v13 = vld [vmem:[%s981_s4 + $0x88] sm:$0xff] }
   0x4   :  { %545 = vmatprep.subr.bf16.mxu1 %v544_v3  ;;  %v145_v12 = vld [vmem:[%s981_s4 + $0x80] sm:$0xff]  ;;  %v550_v14 = vpack.c.bf16 %v39_v11, %v37_v10  ;;  %v130_v17 = vld [vmem:[%s981_s4 + $0x8] sm:$0xff]  ;;  %v147_v18 = vld [vmem:[%s981_s4 + $0x90] sm:$0xff] }
   0x5   :  { %547 = vmatpush1.bf16.msra.mxu1 %v546_v8  ;;  %v552_v15 = vpack.c.bf16 %v146_v13, %v145_v12  ;;  %v129_v16 = vld [vmem:[%s981_s4] sm:$0xff]  ;;  %v148_v19 = vld [vmem:[%s981_s4 + $0x98] sm:$0xff]  ;;  %v131_v23 = vld [vmem:[%s981_s4 + $0x10] sm:$0xff] }
   0x6   :  { %549 = vmatprep.subr.bf16.mxu1 %v548_v9  ;;  %v30_v20 = vld [vmem:[%s977_s0] sm:$0x3]  ;;  %v554_v21 = vpack.c.bf16 %v130_v17, %v129_v16  ;;  %v556_v22 = vpack.c.bf16 %v148_v19, %v147_v18  ;;  %v132_v24 = vld [vmem:[%s981_s4 + $0x18] sm:$0xff]  ;;  %v150_v26 = vld [vmem:[%s981_s4 + $0xa8] sm:$0xff] }
   0x7   :  { %v149_v25 = vld [vmem:[%s981_s4 + $0xa0] sm:$0xff]  ;;  %v558_v27 = vpack.c.bf16 %v132_v24, %v131_v23  ;;  %v134_v30 = vld [vmem:[%s981_s4 + $0x28] sm:$0xff] }
   0x8   :  { %v560_v28 = vpack.c.bf16 %v150_v26, %v149_v25  ;;  %v133_v29 = vld [vmem:[%s981_s4 + $0x20] sm:$0xff] }
   0x9   :  { %551 = vmatpush1.bf16.msra.mxu1 %v550_v14 }
   0xa   :  { %553 = vmatprep.subr.bf16.mxu1 %v552_v15 }
   0xc   :  { %470 = vmatmul.mubr.msk.f32.vlgmr.msra.gmra.mrb[0].mxu1 %vm41_vm0, %v30_v20 }
   0xd   :  { %555 = vmatpush3.bf16.msra.mxu1 %v554_v21 }
   0xe   :  { %557 = vmatprep.subr.bf16.mxu1 %v556_v22 }
   0xf   :  { %15 = vsyncpa [#allocation5], 0  ;;  %v151_v31 = vld [vmem:[%s981_s4 + $0xb0] sm:$0xff]  ;;  %v152_v32 = vld [vmem:[%s981_s4 + $0xb8] sm:$0xff]  ;;  %v562_v33 = vpack.c.bf16 %v134_v30, %v133_v29  ;;  %vm232_vm1 = vcmask 58368   ;;  %vm250_vm2 = vcmask 64512  }
  0x10   :  { %v564_v34 = vpack.c.bf16 %v152_v32, %v151_v31  ;;  %v135_v35 = vld [vmem:[%s981_s4 + $0x30] sm:$0xff]  ;;  %v136_v36 = vld [vmem:[%s981_s4 + $0x38] sm:$0xff]  ;;  %v153_v37 = vld [vmem:[%s981_s4 + $0xc0] sm:$0xff]  ;;  %s672_s29 = smov [#allocation2]  }
  0x11   :  { %559 = vmatpush3.bf16.msra.mxu1 %v558_v27  ;;  %v154_v38 = vld [vmem:[%s981_s4 + $0xc8] sm:$0xff]  ;;  %v566_v39 = vpack.c.bf16 %v136_v36, %v135_v35  ;;  %v137_v41 = vld [vmem:[%s981_s4 + $0x40] sm:$0xff]  ;;  %v155_v43 = vld [vmem:[%s981_s4 + $0xd0] sm:$0xff]  ;;  %s448_s30 = sshll.u32 %s672_s29, 4  ;;  %s449_s30 = int_to_ptr.vmem [resolvable:$true] %s448_s30 }
  0x12   :  { %561 = vmatprep.subr.bf16.mxu1 %v560_v28  ;;  %v568_v40 = vpack.c.bf16 %v154_v38, %v153_v37  ;;  %v138_v42 = vld [vmem:[%s981_s4 + $0x48] sm:$0xff]  ;;  %v156_v44 = vld [vmem:[%s981_s4 + $0xd8] sm:$0xff]  ;;  %v139_v47 = vld [vmem:[%s981_s4 + $0x50] sm:$0xff]  ;;  %s623_s9 = scalar_lea.vmem %s449_s30, 32  ;;  %p628_p1 = scmp.lt.s32.totalorder %s449_s30, %s449_s30 }
  0x13   :  { %v570_v45 = vpack.c.bf16 %v138_v42, %v137_v41  ;;  %v572_v46 = vpack.c.bf16 %v156_v44, %v155_v43  ;;  %v140_v48 = vld [vmem:[%s981_s4 + $0x58] sm:$0xff]  ;;  %v157_v49 = vld [vmem:[%s981_s4 + $0xe0] sm:$0xff]  ;;  %v158_v50 = vld [vmem:[%s981_s4 + $0xe8] sm:$0xff]  ;;  %p624_p0 = scmp.ne.s32.totalorder %s449_s30, %s623_s9  ;;  %p629_p2 = scmp.lt.s32.totalorder %s623_s9, %s623_s9 }
  0x14   :  { %v574_v51 = vpack.c.bf16 %v140_v48, %v139_v47  ;;  %v576_v52 = vpack.c.bf16 %v158_v50, %v157_v49  ;;  %v141_v53 = vld [vmem:[%s981_s4 + $0x60] sm:$0xff]  ;;  %v142_v54 = vld [vmem:[%s981_s4 + $0x68] sm:$0xff]  ;;  %v159_v56 = vld [vmem:[%s981_s4 + $0xf0] sm:$0xff] }
  0x15   :  { %563 = vmatpush3.bf16.msra.mxu1 %v562_v33  ;;  %v578_v55 = vpack.c.bf16 %v142_v54, %v141_v53  ;;  %v160_v57 = vld [vmem:[%s981_s4 + $0xf8] sm:$0xff]  ;;  %v143_v59 = vld [vmem:[%s981_s4 + $0x70] sm:$0xff]  ;;  %v471_v62 = vld.sshfl [vmem:[%s978_s1] sm:$0x33 pattern:$0x76325410]  ;;  %p630_p3 = por %p629_p2, %p628_p1 }
  0x16   :  { %565 = vmatprep.subr.bf16.mxu1 %v564_v34  ;;  %v580_v58 = vpack.c.bf16 %v160_v57, %v159_v56  ;;  %v144_v60 = vld [vmem:[%s981_s4 + $0x78] sm:$0xff]  ;;  %v124_v63 = vcombine.high %v471_v62, %v471_v62  ;;  %v249_v14 = vld [vmem:[%s982_s5 + $0x8] sm:$0xff]  ;;  %v248_v15 = vld [vmem:[%s982_s5] sm:$0xff] }
  0x17   :  { %v582_v61 = vpack.c.bf16 %v144_v60, %v143_v59  ;;  %254 = vmatprep.subr.mxu0 %v249_v14  ;;  %v354_v16 = vld [vmem:[%s983_s6 + $0x80] sm:$0xff]  ;;  %v355_v17 = vld [vmem:[%s983_s6 + $0x88] sm:$0xff]  ;;  %v356_v25 = vld [vmem:[%s983_s6 + $0x90] sm:$0xff]  ;;  %p631_p4 = pnand %p630_p3, %p624_p0 }
  0x18   :  { %255 = vmatpush1.msra.mxu0 %v248_v15  ;;  %v584_v18 = vpack.c.bf16 %v355_v17, %v354_v16  ;;  %v338_v23 = vld [vmem:[%s983_s6] sm:$0xff]  ;;  %v339_v24 = vld [vmem:[%s983_s6 + $0x8] sm:$0xff]  ;;  %v357_v26 = vld [vmem:[%s983_s6 + $0x98] sm:$0xff] }
  0x19   :  { %567 = vmatpush3.bf16.msra.mxu1 %v566_v39  ;;  %v586_v28 = vpack.c.bf16 %v339_v24, %v338_v23  ;;  %v588_v30 = vpack.c.bf16 %v357_v26, %v356_v25  ;;  %v340_v31 = vld [vmem:[%s983_s6 + $0x10] sm:$0xff]  ;;  %v341_v32 = vld [vmem:[%s983_s6 + $0x18] sm:$0xff]  ;;  %v358_v33 = vld [vmem:[%s983_s6 + $0xa0] sm:$0xff] }
  0x1a   :  { %569 = vmatprep.subr.bf16.mxu1 %v568_v40  ;;  %585 = vmatprep.subr.bf16.mxu0 %v584_v18  ;;  %v359_v34 = vld [vmem:[%s983_s6 + $0xa8] sm:$0xff]  ;;  %v590_v35 = vpack.c.bf16 %v341_v32, %v340_v31  ;;  %v342_v37 = vld [vmem:[%s983_s6 + $0x20] sm:$0xff]  ;;  %v360_v39 = vld [vmem:[%s983_s6 + $0xb0] sm:$0xff] }
  0x1b   :  { %v592_v36 = vpack.c.bf16 %v359_v34, %v358_v33  ;;  %v343_v38 = vld [vmem:[%s983_s6 + $0x28] sm:$0xff]  ;;  %v361_v40 = vld [vmem:[%s983_s6 + $0xb8] sm:$0xff]  ;;  %v344_v43 = vld [vmem:[%s983_s6 + $0x30] sm:$0xff] }
  0x1c   :  { %v594_v41 = vpack.c.bf16 %v343_v38, %v342_v37  ;;  %v596_v42 = vpack.c.bf16 %v361_v40, %v360_v39  ;;  %v345_v44 = vld [vmem:[%s983_s6 + $0x38] sm:$0xff]  ;;  %v346_v49 = vld [vmem:[%s983_s6 + $0x40] sm:$0xff]  ;;  %v347_v50 = vld [vmem:[%s983_s6 + $0x48] sm:$0xff] }
  0x1d   :  { %571 = vmatpush3.bf16.msra.mxu1 %v570_v45  ;;  %v362_v45 = vld [vmem:[%s983_s6 + $0xc0] sm:$0xff]  ;;  %v598_v47 = vpack.c.bf16 %v345_v44, %v344_v43  ;;  %v602_v53 = vpack.c.bf16 %v347_v50, %v346_v49  ;;  %v349_v56 = vld [vmem:[%s983_s6 + $0x58] sm:$0xff] }
  0x1e   :  { %573 = vmatprep.subr.bf16.mxu1 %v572_v46  ;;  %v363_v46 = vld [vmem:[%s983_s6 + $0xc8] sm:$0xff]  ;;  %v366_v57 = vld [vmem:[%s983_s6 + $0xe0] sm:$0xff] }
  0x1f   :  { %v600_v48 = vpack.c.bf16 %v363_v46, %v362_v45 }
  0x21   :  { %575 = vmatpush3.bf16.msra.mxu1 %v574_v51  ;;  %v364_v51 = vld [vmem:[%s983_s6 + $0xd0] sm:$0xff] }
  0x22   :  { %577 = vmatprep.subr.bf16.mxu1 %v576_v52  ;;  %v365_v52 = vld [vmem:[%s983_s6 + $0xd8] sm:$0xff] }
  0x23   :  { %v604_v54 = vpack.c.bf16 %v365_v52, %v364_v51 }
  0x25   :  { %579 = vmatpush3.bf16.msra.mxu1 %v578_v55  ;;  %v348_v55 = vld [vmem:[%s983_s6 + $0x50] sm:$0xff] }
  0x26   :  { %581 = vmatprep.subr.bf16.mxu1 %v580_v58  ;;  %v367_v58 = vld [vmem:[%s983_s6 + $0xe8] sm:$0xff]  ;;  %v606_v59 = vpack.c.bf16 %v349_v56, %v348_v55 }
  0x27   :  { %v608_v60 = vpack.c.bf16 %v367_v58, %v366_v57 }
  0x29   :  { %583 = vmatpush3.bf16.msra.mxu1 %v582_v61  ;;  %v350_v61 = vld [vmem:[%s983_s6 + $0x60] sm:$0xff] }
  0xdf   :  { %v111_v0 = vpop.f32.mrb[0].mxu1 }
  0xe0   :  { %v113_v1 = vpop.f32.mrb[1].mxu1  ;;  %v127_v3 = vmul.f32 %v471_v62, %v111_v0  ;;  %v351_v62 = vld [vmem:[%s983_s6 + $0x68] sm:$0xff]  ;;  %v368_v0 = vld [vmem:[%s983_s6 + $0xf0] sm:$0xff] }
  0xe1   :  { %v128_v2 = vmul.f32 %v124_v63, %v113_v1  ;;  %v610_v63 = vpack.c.bf16 %v351_v62, %v350_v61  ;;  %v369_v1 = vld [vmem:[%s983_s6 + $0xf8] sm:$0xff] }
  0xe3   :  { %225 = vmatprep.mubr.f32.mxu1 %v128_v2  ;;  %v612_v2 = vpack.c.bf16 %v369_v1, %v368_v0 }
  0xe4   :  { %226 = vmatmul.mubr.f32.vlgmr.msra.gmra.mrb[2].mxu1 %v127_v3  ;;  %v352_v3 = vld [vmem:[%s983_s6 + $0x70] sm:$0xff] }
 0x1b7   :  { %v506_v4 = vpop.f32.mrb[2].mxu1 }
 0x1b8   :  { %v507_v5 = vpop.f32.mrb[3].mxu1 }
 0x1b9   :  { %v508_v6 = vadd.f32 %v507_v5, %v506_v4  ;;  %v353_v4 = vld [vmem:[%s983_s6 + $0x78] sm:$0xff] }
 0x1ba   :  { %v614_v5 = vpack.c.bf16 %v353_v4, %v352_v3 }
 0x1bb   :  { %v231_v7 = vmul.f32 0.17677669, %v508_v6  ;;  %v473_v6 = vld.sshfl [vmem:[%s979_s2] sm:$0x33 pattern:$0x76325410] }
 0x1bd   :  { %v233_v8 = vsel %vm232_vm1, %v231_v7, -inf }
 0x1be   :  { %234 = vmax.xlane.f32.xlu0 %v233_v8 }
 0x24b   :  { %v235_v9 = vpop.xlane.xlu0 %234 }
 0x24c   :  { %v236_v10 = vsub.f32 %v231_v7, %v235_v9  ;;  %v333_v7 = vcombine.high %v473_v6, %v473_v6 }
 0x24e   :  { %v237_v11 = vmul.f32 1.442695, %v236_v10 }
 0x250   :  { %619 = vpow2.f32 %v237_v11 }
 0x25a   :  { %v620_v12 = vpop.eup %619 }
 0x25b   :  { %v239_v13 = vsel %vm232_vm1, %v620_v12, 0.0 }
 0x25c   :  { %240 = vadd.xlane.f32.xlu0 %v239_v13 }
 0x2e9   :  { %v241_v19 = vpop.xlane.xlu0 %240 }
 0x2ea   :  { %621 = vrcp.f32 %v241_v19 }
 0x2f4   :  { %v622_v20 = vpop.eup %621 }
 0x2f5   :  { %v243_v21 = vmul.f32 %v622_v20, %v241_v19 }
 0x2f7   :  { %v244_v22 = vsub.f32 2.0, %v243_v21 }
 0x2f9   :  { %v245_v27 = vmul.f32 %v622_v20, %v244_v22 }
 0x2fb   :  { %v246_v29 = vmul.f32 %v620_v12, %v245_v27 }
 0x2fd   :  { %247 = vst.msk [vmem:[#allocation2] sm:$0x3] %vm232_vm1, %v246_v29  ;;  %472 = vmatmul.mubr.msk.f32.vlgmr.msra.gmra.mrb[0].mxu0 %vm250_vm2, %v246_v29 }
 0x2fe   :  { %587 = vmatpush3.bf16.msra.mxu0 %v586_v28 }
 0x2ff   :  { %589 = vmatprep.subr.bf16.mxu0 %v588_v30 }
 0x302   :  { %591 = vmatpush3.bf16.msra.mxu0 %v590_v35 }
 0x303   :  { %593 = vmatprep.subr.bf16.mxu0 %v592_v36 }
 0x306   :  { %595 = vmatpush3.bf16.msra.mxu0 %v594_v41 }
 0x307   :  { %597 = vmatprep.subr.bf16.mxu0 %v596_v42 }
 0x30a   :  { %599 = vmatpush3.bf16.msra.mxu0 %v598_v47 }
 0x30b   :  { %601 = vmatprep.subr.bf16.mxu0 %v600_v48 }
 0x30e   :  { %603 = vmatpush3.bf16.msra.mxu0 %v602_v53 }
 0x30f   :  { %605 = vmatprep.subr.bf16.mxu0 %v604_v54 }
 0x312   :  { %607 = vmatpush3.bf16.msra.mxu0 %v606_v59 }
 0x313   :  { %609 = vmatprep.subr.bf16.mxu0 %v608_v60 }
 0x316   :  { %611 = vmatpush3.bf16.msra.mxu0 %v610_v63 }
 0x317   :  { %613 = vmatprep.subr.bf16.mxu0 %v612_v2 }
 0x31a   :  { %615 = vmatpush3.bf16.msra.mxu0 %v614_v5 }
 0x3d0   :  { %v320_v8 = vpop.f32.mrb[0].mxu0 }
 0x3d1   :  { %v322_v9 = vpop.f32.mrb[1].mxu0  ;;  %v336_v11 = vmul.f32 %v473_v6, %v320_v8 }
 0x3d2   :  { %v337_v10 = vmul.f32 %v333_v7, %v322_v9 }
 0x3d4   :  { %434 = vmatprep.mubr.f32.mxu0 %v337_v10 }
 0x3d5   :  { %435 = vmatmul.mubr.f32.vlgmr.msra.gmra.mrb[2].mxu0 %v336_v11 }
 0x3d6   :  { %634 = shalt.err (!%p631_p4)
}
 0x3d7   :  { %s635_s2 = scalar_lea.hbm %s984_s7, 32 }
 0x3d8   :  { %p636_p5 = scmp.ne.s32.totalorder %s984_s7, %s635_s2  ;;  %p639_p6 = scmp.lt.u32.totalorder %s635_s2, %s984_s7 }
 0x3da   :  { %p641_p7 = pnand %p639_p6, %p636_p5 }
 0x3dc   :  { %644 = shalt.err (!%p641_p7)
}
 0x3dd   :  { %451 = dma.vmem_to_hbm [thread:$0]  %s449_s30, 32, %s984_s7, [#allocation3]   ;;  %vm440_vm3 = vcmask 254976  }
 0x3de   :  { %s673_s17 = smov [#allocation4]  }
 0x3df   :  { %s458_s1 = sshll.u32 %s673_s17, 4  ;;  %s459_s1 = int_to_ptr.vmem [resolvable:$true] %s458_s1 }
 0x3e0   :  { %s645_s4 = scalar_lea.vmem %s459_s1, 32  ;;  %p650_p9 = scmp.lt.s32.totalorder %s459_s1, %s459_s1 }
 0x3e1   :  { %p646_p8 = scmp.ne.s32.totalorder %s459_s1, %s645_s4  ;;  %p651_p10 = scmp.lt.s32.totalorder %s645_s4, %s645_s4 }
 0x3e3   :  { %p652_p11 = por %p651_p10, %p650_p9 }
 0x3e5   :  { %p653_p12 = pnand %p652_p11, %p646_p8 }
 0x4a8   :  { %v541_v12 = vpop.f32.mrb[2].mxu0 }
 0x4a9   :  { %v542_v13 = vpop.f32.mrb[3].mxu0 }
 0x4aa   :  { %v543_v14 = vadd.f32 %v542_v13, %v541_v12 }
 0x4ac   :  { %441 = vst.msk [vmem:[#allocation4] sm:$0x3] %vm440_vm3, %v543_v14 }
 0x4ad   :  { %656 = shalt.err (!%p653_p12)
}
 0x4ae   :  { %s657_s0 = scalar_lea.hbm %s985_s8, 32 }
 0x4af   :  { %p658_p13 = scmp.ne.s32.totalorder %s985_s8, %s657_s0  ;;  %p661_p0 = scmp.lt.u32.totalorder %s657_s0, %s985_s8 }
 0x4b1   :  { %p663_p1 = pnand %p661_p0, %p658_p13 }
 0x4b3   :  { %666 = shalt.err (!%p663_p1)
}
 0x4b4   :  { %461 = dma.vmem_to_hbm [thread:$0]  %s459_s1, 32, %s985_s8, [#allocation5]  }
 0x4b5   :  { %667 = dma.done.wait [#allocation3], 32  }
 0x4b6   :  { %668 = vsyncadd [#allocation3], 4294967264 }
 0x4b7   :  { %669 = dma.done.wait [#allocation5], 32  }
 0x4b8   :  { %670 = vsyncadd [#allocation5], 4294967264 }
 0x4b9   :  { %468 = vsyncpa [#allocation3], 1 }
 0x4ba   :  { %469 = vsyncpa [#allocation5], 1 }

</bundles_post_ra>
